<compile_context>
chip_gen: v6e
topology: v6e:2x2x1
jax: 0.10.0
libtpu: 0.0.40
codegen_flags: <defaults>
</compile_context>

<pallas_src>
import functools

import jax
import jax.numpy as jnp
from jax.experimental import pallas as pl
from jax.experimental.pallas import tpu as pltpu


def _round_up(x, m):
    return ((x + m - 1) // m) * m


def _answer_selector_kernel(x_ref, w_ref, o_ref, m_ref, l_ref, *,
                            v_actual, tile_v, num_v_tiles):
    # x_ref: (B, D_pad) bf16 (resident)   w_ref: (D_pad, TILE_V) bf16 (streamed)
    # o_ref: (B, V_pad) f32 (resident)    m_ref/l_ref: (B, 1) f32 scratch
    needs_mask = (num_v_tiles * tile_v) != v_actual

    def mask_cols(s, tile_idx):
        col = tile_idx * tile_v + jax.lax.broadcasted_iota(jnp.int32, s.shape, 1)
        return jnp.where(col < v_actual, s, -jnp.inf)

    # (B, D_pad) @ (D_pad, TILE_V) on the MXU, bf16 inputs, f32 accumulation.
    sim = jnp.dot(x_ref[...], w_ref[...], preferred_element_type=jnp.float32)

    if num_v_tiles == 1:
        # Single grid step (shipped V=1000): no online bookkeeping, no
        # read-modify-write epilogue -- fused log_softmax in registers.
        if needs_mask:
            sim = mask_cols(sim, 0)
        m = jnp.max(sim, axis=1, keepdims=True)
        l = jnp.sum(jnp.exp(sim - m), axis=1, keepdims=True)
        o_ref[...] = sim - (m + jnp.log(l))
        return

    # ---- multi-tile fallback: online max / sum-exp across V tiles ----
    v = pl.program_id(0)
    nv = pl.num_programs(0)

    @pl.when(v == 0)
    def _():
        m_ref[...] = jnp.full_like(m_ref, -jnp.inf)
        l_ref[...] = jnp.zeros_like(l_ref)

    start = pl.multiple_of(v * tile_v, tile_v)

    def update_and_store(s):
        # s is masked BEFORE both the max/sum-exp update and the store.
        m_old = m_ref[...]
        m_new = jnp.maximum(m_old, jnp.max(s, axis=1, keepdims=True))
        l_ref[...] = (l_ref[...] * jnp.exp(m_old - m_new)
                      + jnp.sum(jnp.exp(s - m_new), axis=1, keepdims=True))
        m_ref[...] = m_new
        # Lane-dense, 128-aligned column slice of the resident output block.
        o_ref[:, pl.ds(start, tile_v)] = s

    if needs_mask:
        # Only the last tile can contain padded columns (padding < tile_v), so
        # the iota/compare/select is gated off every other grid step.
        is_last = v == nv - 1

        @pl.when(is_last)
        def _():
            update_and_store(mask_cols(sim, v))

        @pl.when(jnp.logical_not(is_last))
        def _():
            update_and_store(sim)
    else:
        update_and_store(sim)

    # Normalize once, after the last V tile: log_softmax = sim - (m + log l).
    @pl.when(v == nv - 1)
    def _():
        o_ref[...] = o_ref[...] - (m_ref[...] + jnp.log(l_ref[...]))


# Conservative weight-stream VMEM budget (safe on v5e/v6e/v7x).
_VMEM_WEIGHT_BUDGET = 24 * 1024 * 1024


def prepare_answer_weights(glove_cands, *, tile_v=None):
    """One-time (model-load-time) weight prep.

    Returns (w_tiles, meta): w_tiles is (num_tiles, D_pad, tile_v) bf16 with
    each streamed tile fully contiguous in HBM; meta holds static tiling info.
    """
    V, D = glove_cands.shape
    d_pad = _round_up(D, 128)                      # 300 -> 384: full MXU K passes
    if tile_v is None:
        # Largest lane-aligned tile whose double-buffered bf16 footprint fits
        # the budget; at V=1000 this is v_pad (single grid step).
        max_tile = max(128, (_VMEM_WEIGHT_BUDGET // (4 * d_pad)) // 128 * 128)
        tile_v = min(_round_up(V, 128), max_tile)
    else:
        tile_v = max(128, _round_up(tile_v, 128))
        tile_v = min(tile_v, _round_up(V, 128))
    v_pad = _round_up(V, tile_v)
    num_v_tiles = v_pad // tile_v
    assert v_pad - V < tile_v, "a V tile would be all padding (NaN hazard)"

    w = glove_cands.T.astype(jnp.bfloat16)                     # (D, V)
    w = jnp.pad(w, ((0, d_pad - D), (0, v_pad - V)))           # (D_pad, V_pad)
    w = w.reshape(d_pad, num_v_tiles, tile_v).transpose(1, 0, 2)  # contiguous tiles
    meta = dict(v=V, d=D, d_pad=d_pad, tile_v=tile_v, v_pad=v_pad,
                num_v_tiles=num_v_tiles)
    return w, meta


def answer_selector_apply(inputs, w_tiles, meta):
    """inputs: (B, D) f32 -> (B, V) f32 log-probs, using cached prepared weights."""
    B, D = inputs.shape
    assert D == meta["d"]
    d_pad, tile_v = meta["d_pad"], meta["tile_v"]
    v_pad, num_v_tiles = meta["v_pad"], meta["num_v_tiles"]

    # Per-call activation plumbing only (tiny: B*D_pad bf16).
    x = inputs.astype(jnp.bfloat16)
    if d_pad != D:
        x = jnp.pad(x, ((0, 0), (0, d_pad - D)))   # zeros: contraction unchanged

    kernel = functools.partial(
        _answer_selector_kernel,
        v_actual=meta["v"], tile_v=tile_v, num_v_tiles=num_v_tiles)

    vmem_bytes = (4 * d_pad * tile_v            # double-buffered bf16 weight tiles
                  + 4 * B * d_pad               # resident bf16 activations (x2 margin)
                  + 8 * B * v_pad               # resident f32 output (x2 margin)
                  + (4 << 20))                  # scratch + slack
    vmem_limit = int(min(max(vmem_bytes, 16 << 20), 48 << 20))

    out = pl.pallas_call(
        kernel,
        out_shape=jax.ShapeDtypeStruct((B, v_pad), jnp.float32),
        grid=(num_v_tiles,),
        in_specs=[
            pl.BlockSpec((B, d_pad), lambda i: (0, 0)),            # resident activations
            pl.BlockSpec((None, d_pad, tile_v), lambda i: (i, 0, 0)),  # contiguous streamed weight tile
        ],
        out_specs=pl.BlockSpec((B, v_pad), lambda i: (0, 0)),      # resident output
        scratch_shapes=[
            pltpu.VMEM((B, 1), jnp.float32),                       # running max
            pltpu.VMEM((B, 1), jnp.float32),                       # running sum-exp
        ],
        compiler_params=pltpu.CompilerParams(
            dimension_semantics=("arbitrary",),                    # online reduction over V
            vmem_limit_bytes=vmem_limit,
        ),
    )(x, w_tiles)

    return out[:, :meta["v"]]


def answer_selector(inputs, glove_cands, *, tile_v=None):
    """Convenience one-shot wrapper.  Prefer prepare_answer_weights() once +
    answer_selector_apply() per call in real use (weights are load-once)."""
    w_tiles, meta = prepare_answer_weights(glove_cands, tile_v=tile_v)
    return answer_selector_apply(inputs, w_tiles, meta)


if __name__ == "__main__":
    # Deterministic stand-ins for the GloVe answer-candidate matrix / batch:
    # GloVe-300 embeddings, 1000-answer vocab (deliberately not a multiple of
    # 128 to exercise padding/masking), batch of 8 queries.
    key = jax.random.PRNGKey(0)
    k_in, k_glove = jax.random.split(key)

    B, D, V = 8, 300, 1000
    inputs = jax.random.normal(k_in, (B, D), dtype=jnp.float32)
    glove_cands = jax.random.normal(k_glove, (V, D), dtype=jnp.float32)

    # Load-time weight prep (reused across calls).
    w_tiles, meta = prepare_answer_weights(glove_cands)
    w_tiles = jax.block_until_ready(w_tiles)
    assert meta["num_v_tiles"] == 1            # shipped sizes -> single grid step

    pred = jax.block_until_ready(answer_selector_apply(inputs, w_tiles, meta))

    # Reference with the same bf16-input / f32-accumulation contraction the
    # kernel performs (the bf16 cast is the only intended deviation from the
    # f32 PyTorch math).
    sim_ref = jnp.dot(inputs.astype(jnp.bfloat16),
                      glove_cands.T.astype(jnp.bfloat16),
                      preferred_element_type=jnp.float32)
    ref = jax.nn.log_softmax(sim_ref, axis=1)

    assert pred.shape == (B, V)
    assert bool(jnp.allclose(pred, ref, atol=5e-3, rtol=5e-3)), (
        float(jnp.max(jnp.abs(pred - ref))))
    # Rows are valid log-prob distributions.
    assert bool(jnp.allclose(jnp.sum(jnp.exp(pred), axis=1), 1.0, atol=1e-3))

    # Also exercise the multi-tile online-softmax fallback (tile_v < v_pad).
    pred_mt = jax.block_until_ready(answer_selector(inputs, glove_cands, tile_v=256))
    assert bool(jnp.allclose(pred_mt, ref, atol=5e-3, rtol=5e-3)), (
        float(jnp.max(jnp.abs(pred_mt - ref))))

    print("KERNEL_OK")
</pallas_src>

<mosaic_0001>
module attributes {stable_mosaic.version = 11 : i64} {
  func.func @_answer_selector_kernel(%arg0: i32, %arg1: memref<8x384xbf16, #tpu.memory_space<vmem>>, %arg2: memref<1x384x1024xbf16, #tpu.memory_space<vmem>>, %arg3: memref<8x1024xf32, #tpu.memory_space<vmem>>, %arg4: memref<8x1xf32, #tpu.memory_space<vmem>>, %arg5: memref<8x1xf32, #tpu.memory_space<vmem>>) attributes {dimension_semantics = [#tpu.dimension_semantics<arbitrary>], iteration_bounds = array<i64: 1>, scalar_prefetch = 0 : i64, scratch_operands = 2 : i64, tpu.core_type = #tpu.core_type<tc>, window_params = [{pipeline_mode = #tpu.pipeline_mode<synchronous>, transform_indices = @transform_0, window_bounds = array<i64: 8, 384>}, {transform_indices = @transform_1, window_bounds = array<i64: 1, 384, 1024>}, {pipeline_mode = #tpu.pipeline_mode<synchronous>, transform_indices = @transform_2, window_bounds = array<i64: 8, 1024>}]} {
    %c0 = arith.constant 0 : index
    %c0_0 = arith.constant 0 : index
    %0 = vector.load %arg1[%c0, %c0_0] : memref<8x384xbf16, #tpu.memory_space<vmem>>, vector<8x384xbf16>
    %c0_1 = arith.constant 0 : index
    %c0_2 = arith.constant 0 : index
    %c0_3 = arith.constant 0 : index
    %1 = vector.load %arg2[%c0_1, %c0_2, %c0_3] : memref<1x384x1024xbf16, #tpu.memory_space<vmem>>, vector<1x384x1024xbf16>
    %2 = vector.shape_cast %1 : vector<1x384x1024xbf16> to vector<384x1024xbf16>
    %cst = arith.constant dense<0.000000e+00> : vector<8x1024xf32>
    %3 = tpu.matmul %0, %2, %cst {dimension_numbers = #tpu.dot_dimension_numbers<[1], [0], [0], [1], [0, 0, 1, 1], [], []>} : vector<8x384xbf16>, vector<384x1024xbf16>, vector<8x1024xf32> -> vector<8x1024xf32>
    %4 = tpu.iota {dimensions = array<i32: 1>} : vector<8x1024xi32>
    %c0_i32 = arith.constant 0 : i32
    %5 = vector.broadcast %c0_i32 : i32 to vector<8x1024xi32>
    %6 = arith.addi %5, %4 : vector<8x1024xi32>
    %c1000_i32 = arith.constant 1000 : i32
    %7 = vector.broadcast %c1000_i32 : i32 to vector<8x1024xi32>
    %8 = arith.cmpi slt, %6, %7 : vector<8x1024xi32>
    %cst_4 = arith.constant 0xFF800000 : f32
    %9 = vector.broadcast %cst_4 : f32 to vector<8x1024xf32>
    %10 = arith.select %8, %3, %9 : vector<8x1024xi1>, vector<8x1024xf32>
    %cst_5 = arith.constant dense<0xFF800000> : vector<8xf32>
    %11 = vector.multi_reduction <maximumf>, %10, %cst_5 [1] : vector<8x1024xf32> to vector<8xf32>
    %12 = vector.shape_cast %11 : vector<8xf32> to vector<8x1xf32>
    %13 = vector.broadcast %12 : vector<8x1xf32> to vector<8x1024xf32>
    %14 = arith.subf %10, %13 : vector<8x1024xf32>
    %15 = math.exp %14 : vector<8x1024xf32>
    %cst_6 = arith.constant dense<0.000000e+00> : vector<8xf32>
    %16 = vector.multi_reduction <add>, %15, %cst_6 [1] : vector<8x1024xf32> to vector<8xf32>
    %17 = vector.shape_cast %16 : vector<8xf32> to vector<8x1xf32>
    %18 = math.log %17 : vector<8x1xf32>
    %19 = arith.addf %12, %18 : vector<8x1xf32>
    %20 = vector.broadcast %19 : vector<8x1xf32> to vector<8x1024xf32>
    %21 = arith.subf %10, %20 : vector<8x1024xf32>
    %c0_7 = arith.constant 0 : index
    %c0_8 = arith.constant 0 : index
    %22 = vector.load %arg3[%c0_7, %c0_8] : memref<8x1024xf32, #tpu.memory_space<vmem>>, vector<8x1024xf32>
    tpu.vector_store %arg3[%c0_7, %c0_8], %21 {strides = array<i32>} : memref<8x1024xf32, #tpu.memory_space<vmem>>, vector<8x1024xf32>,
    return
  }
  func.func @transform_0(%arg0: i32) -> (i32, i32) {
    %c0_i32 = arith.constant 0 : i32
    %c0_i32_0 = arith.constant 0 : i32
    %c0_i32_1 = arith.constant 0 : i32
    return %c0_i32, %c0_i32_0 : i32, i32
  }
  func.func @transform_1(%arg0: i32) -> (i32, i32, i32) {
    %c0_i32 = arith.constant 0 : i32
    %c0_i32_0 = arith.constant 0 : i32
    %c0_i32_1 = arith.constant 0 : i32
    return %arg0, %c0_i32, %c0_i32_0 : i32, i32, i32
  }
  func.func @transform_2(%arg0: i32) -> (i32, i32) {
    %c0_i32 = arith.constant 0 : i32
    %c0_i32_0 = arith.constant 0 : i32
    %c0_i32_1 = arith.constant 0 : i32
    return %c0_i32, %c0_i32_0 : i32, i32
  }
}

</mosaic_0001>

<bundles_post_ra>
// kernel: tpu_custom_call.1
= control target key start
LH: loop header
LB: loop body
LE: loop exit
PB: predicated region body
PF: predicated region fallthrough
CT: control target
= control target key end

     0   :  { %7 = vsyncpa [#allocation5], 0  ;;  %s2020_s0 = inlined_call_operand.hbm [shape: bf16[8,384], index: 0, kind: input, shape index: {}]   ;;  %s2021_s1 = inlined_call_operand.hbm [shape: bf16[1,384,1024], index: 1, kind: input, shape index: {}]   ;;  %s2022_s2 = inlined_call_operand.hbm [shape: f32[8,1024], index: 2, kind: output, shape index: {}]  }
   0x1   :  { %8 = vsyncpa [#allocation8], 0 }
   0x2   :  { %9 = vsyncpa [#allocation6], 0  ;;  %s1922_s9 = smov [#allocation4]   ;;  %s1923_s11 = smov [#allocation7]  }
   0x3   :  { %s16_s10 = sshll.u32 %s1922_s9, 4  ;;  %s25_s12 = sshll.u32 %s1923_s11, 4  ;;  %s17_s10 = int_to_ptr.vmem [resolvable:$true] %s16_s10  ;;  %s26_s12 = int_to_ptr.vmem [resolvable:$true] %s25_s12 }
   0x4   :  { %s1864_s13 = scalar_lea.vmem %s17_s10, 192  ;;  %p1869_p1 = scmp.lt.s32.totalorder %s17_s10, %s17_s10 }
   0x5   :  { %p1865_p0 = scmp.ne.s32.totalorder %s17_s10, %s1864_s13  ;;  %p1870_p2 = scmp.lt.s32.totalorder %s1864_s13, %s1864_s13 }
   0x7   :  { %p1871_p3 = por %p1870_p2, %p1869_p1 }
   0x9   :  { %p1872_p4 = pnand %p1871_p3, %p1865_p0 }
   0xb   :  { %1875 = shalt.err (!%p1872_p4)
}
   0xc   :  { %19 = dma.hbm_to_vmem [thread:$0]  %s2020_s0, 192, %s17_s10, [#allocation5]  }
   0xd   :  { %s1884_s16 = scalar_lea.vmem %s26_s12, 24576  ;;  %p1889_p6 = scmp.lt.s32.totalorder %s26_s12, %s26_s12 }
   0xe   :  { %p1885_p5 = scmp.ne.s32.totalorder %s26_s12, %s1884_s16  ;;  %p1890_p7 = scmp.lt.s32.totalorder %s1884_s16, %s1884_s16 }
  0x10   :  { %p1891_p8 = por %p1890_p7, %p1889_p6 }
  0x12   :  { %p1892_p9 = pnand %p1891_p8, %p1885_p5 }
  0x14   :  { %1895 = shalt.err (!%p1892_p9)
}
  0x15   :  { %s1924_s17 = smov 512   ;;  %s1925_s18 = smov 32  }
  0x16   :  { %31 = dma.hbm_to_vmem [thread:$0]  %s2021_s1, 24576, %s26_s12, [#allocation8], %s1924_s17, %s1924_s17, %s1925_s18  }
  0x17   :  { %1916 = dma.done.wait [#allocation5], 192  }
  0x18   :  { %1917 = vsyncadd [#allocation5], 4294967104 }
  0x19   :  { %1918 = dma.done.wait [#allocation8], 24576  }
  0x1a   :  { %1919 = vsyncadd [#allocation8], 4294942720  ;;  %v1926_v0 = vmov 0   ;;  %v97_v1 = vld [vmem:[#allocation7 + $0x1c0] sm:$0xff]  ;;  %v1950_v57 = vld [vmem:[#allocation4] sm:$0xff]  ;;  %s1927_s0 = smov [#allocation9]  }
  0x1b   :  { %1277 = vmatprep.mubr.bf16.mxu1 %v1926_v0  ;;  %v101_v2 = vld [vmem:[#allocation7 + $0x1e0] sm:$0xff]  ;;  %v1954_v60 = vcombine.high %v1950_v57, %v1950_v57  ;;  %s1624_s1 = sshll.u32 %s1927_s0, 4  ;;  %s1625_s1 = int_to_ptr.vmem [resolvable:$true] %s1624_s1 }
  0x1c   :  { %v225_v3 = vld [vmem:[#allocation7 + $0x5c0] sm:$0xff]  ;;  %v1694_v4 = vcombine.high %v97_v1, %v101_v2  ;;  %v1693_v6 = vcombine.low %v97_v1, %v101_v2  ;;  %s1896_s21 = scalar_lea.vmem %s1625_s1, 1024  ;;  %p1901_p11 = scmp.lt.s32.totalorder %s1625_s1, %s1625_s1 }
  0x1d   :  { %v229_v5 = vld [vmem:[#allocation7 + $0x5e0] sm:$0xff]  ;;  %1236 = vmatprep.mubr.bf16.mxu0 %v1954_v60  ;;  %p1897_p10 = scmp.ne.s32.totalorder %s1625_s1, %s1896_s21  ;;  %p1902_p12 = scmp.lt.s32.totalorder %s1896_s21, %s1896_s21 }
  0x1e   :  { %v89_v7 = vld [vmem:[#allocation7 + $0x180] sm:$0xff]  ;;  %v1822_v9 = vcombine.high %v225_v3, %v229_v5  ;;  %v1821_v10 = vcombine.low %v225_v3, %v229_v5  ;;  %1204 = vmatprep.subr.bf16.mxu0 %v1694_v4  ;;  %v98_v4 = vld [vmem:[#allocation7 + $0x1c8] sm:$0xff] }
  0x1f   :  { %v93_v8 = vld [vmem:[#allocation7 + $0x1a0] sm:$0xff]  ;;  %1205 = vmatpush1.bf16.msra.mxu0 %v1693_v6  ;;  %v102_v5 = vld [vmem:[#allocation7 + $0x1e8] sm:$0xff]  ;;  %p1903_p13 = por %p1902_p12, %p1901_p11 }
  0x20   :  { %v1686_v11 = vcombine.high %v89_v7, %v93_v8  ;;  %v217_v12 = vld [vmem:[#allocation7 + $0x580] sm:$0xff]  ;;  %1245 = vmatprep.subr.bf16.mxu1 %v1822_v9  ;;  %v1685_v19 = vcombine.low %v89_v7, %v93_v8  ;;  %v1696_v9 = vcombine.high %v98_v4, %v102_v5 }
  0x21   :  { %v221_v13 = vld [vmem:[#allocation7 + $0x5a0] sm:$0xff]  ;;  %1246 = vmatpush1.bf16.msra.mxu1 %v1821_v10  ;;  %p1904_p0 = pnand %p1903_p13, %p1897_p10 }
  0x22   :  { %v81_v14 = vld [vmem:[#allocation7 + $0x140] sm:$0xff]  ;;  %v1814_v15 = vcombine.high %v217_v12, %v221_v13  ;;  %1206 = vmatprep.subr.bf16.mxu0 %v1686_v11  ;;  %v1813_v20 = vcombine.low %v217_v12, %v221_v13  ;;  %v90_v12 = vld [vmem:[#allocation7 + $0x188] sm:$0xff] }
  0x23   :  { %v85_v16 = vld [vmem:[#allocation7 + $0x160] sm:$0xff]  ;;  %1207 = vmatpush1.bf16.msra.mxu0 %v1685_v19  ;;  %v94_v13 = vld [vmem:[#allocation7 + $0x1a8] sm:$0xff] }
  0x24   :  { %v209_v17 = vld [vmem:[#allocation7 + $0x540] sm:$0xff]  ;;  %v1678_v21 = vcombine.high %v81_v14, %v85_v16  ;;  %1247 = vmatprep.subr.bf16.mxu1 %v1814_v15  ;;  %v1677_v27 = vcombine.low %v81_v14, %v85_v16  ;;  %v1957_v14 = vld [vmem:[#allocation4 + $0x8] ss:$0 sps:$4 sm:$0xff]   ;;  %v1695_v16 = vcombine.low %v98_v4, %v102_v5 }
  0x25   :  { %v213_v18 = vld [vmem:[#allocation7 + $0x560] sm:$0xff]  ;;  %1248 = vmatpush1.bf16.msra.mxu1 %v1813_v20 }
  0x26   :  { %v1806_v22 = vcombine.high %v209_v17, %v213_v18  ;;  %v73_v23 = vld [vmem:[#allocation7 + $0x100] sm:$0xff]  ;;  %1208 = vmatprep.subr.bf16.mxu0 %v1678_v21  ;;  %v1805_v28 = vcombine.low %v209_v17, %v213_v18  ;;  %v1688_v18 = vcombine.high %v90_v12, %v94_v13  ;;  %v82_v21 = vld [vmem:[#allocation7 + $0x148] sm:$0xff] }
  0x27   :  { %v77_v24 = vld [vmem:[#allocation7 + $0x120] sm:$0xff]  ;;  %1209 = vmatpush1.bf16.msra.mxu0 %v1677_v27 }
  0x28   :  { %v201_v25 = vld [vmem:[#allocation7 + $0x500] sm:$0xff]  ;;  %v1670_v29 = vcombine.high %v73_v23, %v77_v24  ;;  %1249 = vmatprep.subr.bf16.mxu1 %v1806_v22  ;;  %v1669_v35 = vcombine.low %v73_v23, %v77_v24  ;;  %v86_v22 = vld [vmem:[#allocation7 + $0x168] sm:$0xff]  ;;  %v1687_v24 = vcombine.low %v90_v12, %v94_v13 }
  0x29   :  { %v205_v26 = vld [vmem:[#allocation7 + $0x520] sm:$0xff]  ;;  %1250 = vmatpush1.bf16.msra.mxu1 %v1805_v28 }
  0x2a   :  { %v1798_v30 = vcombine.high %v201_v25, %v205_v26  ;;  %v65_v31 = vld [vmem:[#allocation7 + $0xc0] sm:$0xff]  ;;  %1210 = vmatprep.subr.bf16.mxu0 %v1670_v29  ;;  %v1797_v36 = vcombine.low %v201_v25, %v205_v26  ;;  %v1680_v26 = vcombine.high %v82_v21, %v86_v22  ;;  %v74_v29 = vld [vmem:[#allocation7 + $0x108] sm:$0xff] }
  0x2b   :  { %v69_v32 = vld [vmem:[#allocation7 + $0xe0] sm:$0xff]  ;;  %1211 = vmatpush1.bf16.msra.mxu0 %v1669_v35 }
  0x2c   :  { %v193_v33 = vld [vmem:[#allocation7 + $0x4c0] sm:$0xff]  ;;  %v1662_v37 = vcombine.high %v65_v31, %v69_v32  ;;  %1251 = vmatprep.subr.bf16.mxu1 %v1798_v30  ;;  %v1661_v43 = vcombine.low %v65_v31, %v69_v32  ;;  %v78_v30 = vld [vmem:[#allocation7 + $0x128] sm:$0xff]  ;;  %v1679_v32 = vcombine.low %v82_v21, %v86_v22 }
  0x2d   :  { %v197_v34 = vld [vmem:[#allocation7 + $0x4e0] sm:$0xff]  ;;  %1252 = vmatpush1.bf16.msra.mxu1 %v1797_v36 }
  0x2e   :  { %v1790_v38 = vcombine.high %v193_v33, %v197_v34  ;;  %v57_v39 = vld [vmem:[#allocation7 + $0x80] sm:$0xff]  ;;  %1212 = vmatprep.subr.bf16.mxu0 %v1662_v37  ;;  %v1789_v44 = vcombine.low %v193_v33, %v197_v34  ;;  %v1672_v34 = vcombine.high %v74_v29, %v78_v30  ;;  %v66_v37 = vld [vmem:[#allocation7 + $0xc8] sm:$0xff] }
  0x2f   :  { %v61_v40 = vld [vmem:[#allocation7 + $0xa0] sm:$0xff]  ;;  %1213 = vmatpush1.bf16.msra.mxu0 %v1661_v43 }
  0x30   :  { %v185_v41 = vld [vmem:[#allocation7 + $0x480] sm:$0xff]  ;;  %v1654_v45 = vcombine.high %v57_v39, %v61_v40  ;;  %1253 = vmatprep.subr.bf16.mxu1 %v1790_v38  ;;  %v1653_v51 = vcombine.low %v57_v39, %v61_v40  ;;  %v70_v38 = vld [vmem:[#allocation7 + $0xe8] sm:$0xff]  ;;  %v1671_v40 = vcombine.low %v74_v29, %v78_v30 }
  0x31   :  { %v189_v42 = vld [vmem:[#allocation7 + $0x4a0] sm:$0xff]  ;;  %1254 = vmatpush1.bf16.msra.mxu1 %v1789_v44 }
  0x32   :  { %v1782_v46 = vcombine.high %v185_v41, %v189_v42  ;;  %v49_v47 = vld [vmem:[#allocation7 + $0x40] sm:$0xff]  ;;  %1214 = vmatprep.subr.bf16.mxu0 %v1654_v45  ;;  %v1781_v52 = vcombine.low %v185_v41, %v189_v42  ;;  %v1664_v42 = vcombine.high %v66_v37, %v70_v38  ;;  %v58_v45 = vld [vmem:[#allocation7 + $0x88] sm:$0xff] }
  0x33   :  { %v53_v48 = vld [vmem:[#allocation7 + $0x60] sm:$0xff]  ;;  %1215 = vmatpush1.bf16.msra.mxu0 %v1653_v51 }
  0x34   :  { %v177_v49 = vld [vmem:[#allocation7 + $0x440] sm:$0xff]  ;;  %v1646_v53 = vcombine.high %v49_v47, %v53_v48  ;;  %1255 = vmatprep.subr.bf16.mxu1 %v1782_v46  ;;  %v1645_v61 = vcombine.low %v49_v47, %v53_v48  ;;  %v62_v46 = vld [vmem:[#allocation7 + $0xa8] sm:$0xff]  ;;  %v1663_v48 = vcombine.low %v66_v37, %v70_v38 }
  0x35   :  { %v181_v50 = vld [vmem:[#allocation7 + $0x460] sm:$0xff]  ;;  %1256 = vmatpush1.bf16.msra.mxu1 %v1781_v52 }
  0x36   :  { %v1774_v54 = vcombine.high %v177_v49, %v181_v50  ;;  %v41_v55 = vld [vmem:[#allocation7] sm:$0xff]  ;;  %1216 = vmatprep.subr.bf16.mxu0 %v1646_v53  ;;  %v1773_v62 = vcombine.low %v177_v49, %v181_v50  ;;  %v1656_v50 = vcombine.high %v58_v45, %v62_v46  ;;  %v50_v53 = vld [vmem:[#allocation7 + $0x48] sm:$0xff] }
  0x37   :  { %v45_v56 = vld [vmem:[#allocation7 + $0x20] sm:$0xff]  ;;  %1217 = vmatpush1.bf16.msra.mxu0 %v1645_v61 }
  0x38   :  { %v169_v58 = vld [vmem:[#allocation7 + $0x400] sm:$0xff]  ;;  %v1638_v63 = vcombine.high %v41_v55, %v45_v56  ;;  %1257 = vmatprep.subr.bf16.mxu1 %v1774_v54  ;;  %v1637_v6 = vcombine.low %v41_v55, %v45_v56  ;;  %v54_v54 = vld [vmem:[#allocation7 + $0x68] sm:$0xff]  ;;  %v1655_v56 = vcombine.low %v58_v45, %v62_v46 }
  0x39   :  { %v173_v59 = vld [vmem:[#allocation7 + $0x420] sm:$0xff]  ;;  %1258 = vmatpush1.bf16.msra.mxu1 %v1773_v62 }
  0x3a   :  { %v1766_v1 = vcombine.high %v169_v58, %v173_v59  ;;  %v161_v2 = vld [vmem:[#allocation7 + $0x3c0] sm:$0xff]  ;;  %1218 = vmatprep.subr.bf16.mxu0 %v1638_v63  ;;  %v1765_v7 = vcombine.low %v169_v58, %v173_v59  ;;  %v1648_v59 = vcombine.high %v50_v53, %v54_v54  ;;  %v42_v63 = vld [vmem:[#allocation7 + $0x8] sm:$0xff] }
  0x3b   :  { %v165_v3 = vld [vmem:[#allocation7 + $0x3e0] sm:$0xff]  ;;  %1219 = vmatpush1.bf16.msra.mxu0 %v1637_v6  ;;  %v226_v6 = vld [vmem:[#allocation7 + $0x5c8] sm:$0xff] }
  0x3c   :  { %v1758_v8 = vcombine.high %v161_v2, %v165_v3  ;;  %1259 = vmatprep.subr.bf16.mxu1 %v1766_v1  ;;  %v153_v10 = vld [vmem:[#allocation7 + $0x380] sm:$0xff]  ;;  %v1757_v15 = vcombine.low %v161_v2, %v165_v3  ;;  %v46_v1 = vld [vmem:[#allocation7 + $0x28] sm:$0xff]  ;;  %v1647_v3 = vcombine.low %v50_v53, %v54_v54 }
  0x3d   :  { %v157_v11 = vld [vmem:[#allocation7 + $0x3a0] sm:$0xff]  ;;  %1260 = vmatpush1.bf16.msra.mxu1 %v1765_v7  ;;  %v1640_v5 = vcombine.high %v42_v63, %v46_v1  ;;  %v230_v7 = vld [vmem:[#allocation7 + $0x5e8] sm:$0xff] }
  0x3e   :  { %1220 = vmatprep.subr.bf16.mxu0 %v1758_v8  ;;  %v1750_v17 = vcombine.high %v153_v10, %v157_v11  ;;  %1286 = vmatprep.subr.bf16.mxu1 %v1696_v9  ;;  %v145_v19 = vld [vmem:[#allocation7 + $0x340] sm:$0xff]  ;;  %v1749_v23 = vcombine.low %v153_v10, %v157_v11  ;;  %v162_v8 = vld [vmem:[#allocation7 + $0x3c8] sm:$0xff]  ;;  %v1639_v11 = vcombine.low %v42_v63, %v46_v1 }
  0x3f   :  { %v149_v20 = vld [vmem:[#allocation7 + $0x360] sm:$0xff]  ;;  %1221 = vmatpush2.bf16.msra.mxu0 %v1757_v15  ;;  %v166_v9 = vld [vmem:[#allocation7 + $0x3e8] sm:$0xff]  ;;  %v1824_v12 = vcombine.high %v226_v6, %v230_v7 }
  0x40   :  { %1278 = vmatmul.mubr.bf16.vlgmr.msra.gmra.mxu1 %v1957_v14  ;;  %1222 = vmatprep.subr.bf16.mxu0 %v1750_v17  ;;  %v1742_v25 = vcombine.high %v145_v19, %v149_v20  ;;  %v137_v27 = vld [vmem:[#allocation7 + $0x300] sm:$0xff]  ;;  %v1741_v31 = vcombine.low %v145_v19, %v149_v20  ;;  %v1760_v13 = vcombine.high %v162_v8, %v166_v9  ;;  %v218_v15 = vld [vmem:[#allocation7 + $0x588] sm:$0xff] }
  0x41   :  { %1287 = vmatpush1.bf16.msra.mxu1 %v1695_v16  ;;  %v141_v28 = vld [vmem:[#allocation7 + $0x320] sm:$0xff]  ;;  %1318 = vmatprep.mubr.bf16.mxu1 %v1954_v60  ;;  %v222_v16 = vld [vmem:[#allocation7 + $0x5a8] sm:$0xff]  ;;  %v1963_v17 = vcombine.low %v1950_v57, %v1950_v57  ;;  %v1823_v20 = vcombine.low %v226_v6, %v230_v7  ;;  %v1759_v21 = vcombine.low %v162_v8, %v166_v9 }
  0x42   :  { %1288 = vmatprep.subr.bf16.mxu1 %v1688_v18  ;;  %v1734_v33 = vcombine.high %v137_v27, %v141_v28  ;;  %v129_v35 = vld [vmem:[#allocation7 + $0x2c0] sm:$0xff]  ;;  %v1733_v39 = vcombine.low %v137_v27, %v141_v28  ;;  %v154_v18 = vld [vmem:[#allocation7 + $0x388] sm:$0xff]  ;;  %v1816_v22 = vcombine.high %v218_v15, %v222_v16  ;;  %v1815_v28 = vcombine.low %v218_v15, %v222_v16 }
  0x43   :  { %1223 = vmatpush2.bf16.msra.mxu0 %v1749_v23  ;;  %v133_v36 = vld [vmem:[#allocation7 + $0x2e0] sm:$0xff]  ;;  %v158_v19 = vld [vmem:[#allocation7 + $0x3a8] sm:$0xff] }
  0x44   :  { %1224 = vmatprep.subr.bf16.mxu0 %v1742_v25  ;;  %v1726_v41 = vcombine.high %v129_v35, %v133_v36  ;;  %v121_v43 = vld [vmem:[#allocation7 + $0x280] sm:$0xff]  ;;  %v1725_v47 = vcombine.low %v129_v35, %v133_v36  ;;  %v1752_v23 = vcombine.high %v154_v18, %v158_v19  ;;  %v214_v25 = vld [vmem:[#allocation7 + $0x568] sm:$0xff]  ;;  %v1751_v57 = vcombine.low %v154_v18, %v158_v19 }
  0x45   :  { %1289 = vmatpush1.bf16.msra.mxu1 %v1687_v24  ;;  %v125_v44 = vld [vmem:[#allocation7 + $0x2a0] sm:$0xff]  ;;  %v210_v24 = vld [vmem:[#allocation7 + $0x548] sm:$0xff] }
  0x46   :  { %1290 = vmatprep.subr.bf16.mxu1 %v1680_v26  ;;  %v1718_v49 = vcombine.high %v121_v43, %v125_v44  ;;  %v113_v51 = vld [vmem:[#allocation7 + $0x240] sm:$0xff]  ;;  %v1717_v55 = vcombine.low %v121_v43, %v125_v44  ;;  %v146_v26 = vld [vmem:[#allocation7 + $0x348] sm:$0xff]  ;;  %v1808_v29 = vcombine.high %v210_v24, %v214_v25  ;;  %v1807_v35 = vcombine.low %v210_v24, %v214_v25 }
  0x47   :  { %1225 = vmatpush2.bf16.msra.mxu0 %v1741_v31  ;;  %v117_v52 = vld [vmem:[#allocation7 + $0x260] sm:$0xff]  ;;  %v150_v27 = vld [vmem:[#allocation7 + $0x368] sm:$0xff] }
  0x48   :  { %1226 = vmatprep.subr.bf16.mxu0 %v1734_v33  ;;  %v1710_v58 = vcombine.high %v113_v51, %v117_v52  ;;  %v105_v61 = vld [vmem:[#allocation7 + $0x200] sm:$0xff]  ;;  %v1709_v2 = vcombine.low %v113_v51, %v117_v52  ;;  %v1744_v30 = vcombine.high %v146_v26, %v150_v27  ;;  %v202_v31 = vld [vmem:[#allocation7 + $0x508] sm:$0xff]  ;;  %v1743_v36 = vcombine.low %v146_v26, %v150_v27 }
  0x49   :  { %1291 = vmatpush1.bf16.msra.mxu1 %v1679_v32  ;;  %v109_v62 = vld [vmem:[#allocation7 + $0x220] sm:$0xff]  ;;  %v206_v32 = vld [vmem:[#allocation7 + $0x528] sm:$0xff] }
  0x4a   :  { %1292 = vmatprep.subr.bf16.mxu1 %v1672_v34  ;;  %v1702_v4 = vcombine.high %v105_v61, %v109_v62  ;;  %v1701_v10 = vcombine.low %v105_v61, %v109_v62  ;;  %v138_v33 = vld [vmem:[#allocation7 + $0x308] sm:$0xff]  ;;  %v1800_v37 = vcombine.high %v202_v31, %v206_v32  ;;  %v1799_v43 = vcombine.low %v202_v31, %v206_v32 }
  0x4b   :  { %1227 = vmatpush2.bf16.msra.mxu0 %v1733_v39  ;;  %v142_v34 = vld [vmem:[#allocation7 + $0x328] sm:$0xff] }
  0x4c   :  { %1228 = vmatprep.subr.bf16.mxu0 %v1726_v41  ;;  %v1736_v38 = vcombine.high %v138_v33, %v142_v34  ;;  %v194_v39 = vld [vmem:[#allocation7 + $0x4c8] sm:$0xff]  ;;  %v1735_v44 = vcombine.low %v138_v33, %v142_v34 }
  0x4d   :  { %1293 = vmatpush1.bf16.msra.mxu1 %v1671_v40  ;;  %v198_v40 = vld [vmem:[#allocation7 + $0x4e8] sm:$0xff] }
  0x4e   :  { %1294 = vmatprep.subr.bf16.mxu1 %v1664_v42  ;;  %v130_v41 = vld [vmem:[#allocation7 + $0x2c8] sm:$0xff]  ;;  %v1792_v45 = vcombine.high %v194_v39, %v198_v40  ;;  %v1791_v51 = vcombine.low %v194_v39, %v198_v40 }
  0x4f   :  { %1229 = vmatpush2.bf16.msra.mxu0 %v1725_v47  ;;  %v134_v42 = vld [vmem:[#allocation7 + $0x2e8] sm:$0xff] }
  0x50   :  { %1230 = vmatprep.subr.bf16.mxu0 %v1718_v49  ;;  %v1728_v46 = vcombine.high %v130_v41, %v134_v42  ;;  %v186_v47 = vld [vmem:[#allocation7 + $0x488] sm:$0xff]  ;;  %v1727_v52 = vcombine.low %v130_v41, %v134_v42 }
  0x51   :  { %1295 = vmatpush1.bf16.msra.mxu1 %v1663_v48  ;;  %v190_v48 = vld [vmem:[#allocation7 + $0x4a8] sm:$0xff] }
  0x52   :  { %1296 = vmatprep.subr.bf16.mxu1 %v1656_v50  ;;  %v122_v49 = vld [vmem:[#allocation7 + $0x288] sm:$0xff]  ;;  %v1784_v53 = vcombine.high %v186_v47, %v190_v48  ;;  %v1783_v61 = vcombine.low %v186_v47, %v190_v48 }
  0x53   :  { %1231 = vmatpush2.bf16.msra.mxu0 %v1717_v55  ;;  %v126_v50 = vld [vmem:[#allocation7 + $0x2a8] sm:$0xff] }
  0x54   :  { %1232 = vmatprep.subr.bf16.mxu0 %v1710_v58  ;;  %v1720_v54 = vcombine.high %v122_v49, %v126_v50  ;;  %v178_v55 = vld [vmem:[#allocation7 + $0x448] sm:$0xff]  ;;  %v1719_v62 = vcombine.low %v122_v49, %v126_v50 }
  0x55   :  { %1297 = vmatpush1.bf16.msra.mxu1 %v1655_v56  ;;  %v182_v56 = vld [vmem:[#allocation7 + $0x468] sm:$0xff] }
  0x56   :  { %1298 = vmatprep.subr.bf16.mxu1 %v1648_v59  ;;  %v114_v58 = vld [vmem:[#allocation7 + $0x248] sm:$0xff]  ;;  %v1776_v63 = vcombine.high %v178_v55, %v182_v56  ;;  %v1775_v6 = vcombine.low %v178_v55, %v182_v56 }
  0x57   :  { %1233 = vmatpush2.bf16.msra.mxu0 %v1709_v2  ;;  %v118_v59 = vld [vmem:[#allocation7 + $0x268] sm:$0xff] }
  0x58   :  { %1234 = vmatprep.subr.bf16.mxu0 %v1702_v4  ;;  %v1712_v1 = vcombine.high %v114_v58, %v118_v59  ;;  %v170_v2 = vld [vmem:[#allocation7 + $0x408] sm:$0xff]  ;;  %v1711_v7 = vcombine.low %v114_v58, %v118_v59 }
  0x59   :  { %1299 = vmatpush1.bf16.msra.mxu1 %v1647_v3  ;;  %v174_v3 = vld [vmem:[#allocation7 + $0x428] sm:$0xff] }
  0x5a   :  { %1300 = vmatprep.subr.bf16.mxu1 %v1640_v5  ;;  %v106_v4 = vld [vmem:[#allocation7 + $0x208] sm:$0xff]  ;;  %v1768_v8 = vcombine.high %v170_v2, %v174_v3  ;;  %v1767_v15 = vcombine.low %v170_v2, %v174_v3 }
  0x5b   :  { %1235 = vmatpush2.bf16.msra.mxu0 %v1701_v10  ;;  %v110_v5 = vld [vmem:[#allocation7 + $0x228] sm:$0xff]  ;;  %v99_v10 = vld [vmem:[#allocation7 + $0x1d0] sm:$0xff] }
  0x5c   :  { %1327 = vmatprep.subr.bf16.mxu0 %v1824_v12  ;;  %v1704_v9 = vcombine.high %v106_v4, %v110_v5  ;;  %v227_v12 = vld [vmem:[#allocation7 + $0x5d0] sm:$0xff]  ;;  %v1703_v16 = vcombine.low %v106_v4, %v110_v5 }
  0x5d   :  { %1301 = vmatpush1.bf16.msra.mxu1 %v1639_v11  ;;  %v103_v11 = vld [vmem:[#allocation7 + $0x1f0] sm:$0xff] }
  0x5e   :  { %1302 = vmatprep.subr.bf16.mxu1 %v1760_v13  ;;  %1237 = vmatmul.mubr.bf16.vlgmr.msra.gmra.mxu0 %v1963_v17  ;;  %v231_v13 = vld [vmem:[#allocation7 + $0x5f0] sm:$0xff]  ;;  %v1698_v18 = vcombine.high %v99_v10, %v103_v11  ;;  %v1697_v24 = vcombine.low %v99_v10, %v103_v11 }
  0x5f   :  { %1328 = vmatpush1.bf16.msra.mxu0 %v1823_v20  ;;  %1359 = vmatprep.mubr.bf16.mxu0 %v1926_v0  ;;  %v1826_v19 = vcombine.high %v227_v12, %v231_v13  ;;  %v91_v20 = vld [vmem:[#allocation7 + $0x190] sm:$0xff]  ;;  %v1825_v25 = vcombine.low %v227_v12, %v231_v13 }
  0x60   :  { %1329 = vmatprep.subr.bf16.mxu0 %v1816_v22  ;;  %v219_v22 = vld [vmem:[#allocation7 + $0x590] sm:$0xff] }
  0x61   :  { %1303 = vmatpush2.bf16.msra.mxu1 %v1759_v21  ;;  %v95_v21 = vld [vmem:[#allocation7 + $0x1b0] sm:$0xff] }
  0x62   :  { %1304 = vmatprep.subr.bf16.mxu1 %v1752_v23  ;;  %v223_v23 = vld [vmem:[#allocation7 + $0x5b0] sm:$0xff]  ;;  %v1690_v26 = vcombine.high %v91_v20, %v95_v21  ;;  %v1689_v31 = vcombine.low %v91_v20, %v95_v21 }
  0x63   :  { %1330 = vmatpush1.bf16.msra.mxu0 %v1815_v28  ;;  %v1818_v27 = vcombine.high %v219_v22, %v223_v23  ;;  %v83_v28 = vld [vmem:[#allocation7 + $0x150] sm:$0xff]  ;;  %v1817_v32 = vcombine.low %v219_v22, %v223_v23 }
  0x64   :  { %1331 = vmatprep.subr.bf16.mxu0 %v1808_v29  ;;  %v211_v29 = vld [vmem:[#allocation7 + $0x550] sm:$0xff] }
  0x65   :  { %1305 = vmatpush2.bf16.msra.mxu1 %v1751_v57  ;;  %v87_v57 = vld [vmem:[#allocation7 + $0x170] sm:$0xff] }
  0x66   :  { %1306 = vmatprep.subr.bf16.mxu1 %v1744_v30  ;;  %v215_v30 = vld [vmem:[#allocation7 + $0x570] sm:$0xff]  ;;  %v1682_v33 = vcombine.high %v83_v28, %v87_v57  ;;  %v1681_v39 = vcombine.low %v83_v28, %v87_v57 }
  0x67   :  { %1332 = vmatpush1.bf16.msra.mxu0 %v1807_v35  ;;  %v1810_v34 = vcombine.high %v211_v29, %v215_v30  ;;  %v75_v35 = vld [vmem:[#allocation7 + $0x110] sm:$0xff]  ;;  %v1809_v40 = vcombine.low %v211_v29, %v215_v30 }
  0x68   :  { %1333 = vmatprep.subr.bf16.mxu0 %v1800_v37  ;;  %v203_v37 = vld [vmem:[#allocation7 + $0x510] sm:$0xff] }
  0x69   :  { %1307 = vmatpush2.bf16.msra.mxu1 %v1743_v36  ;;  %v79_v36 = vld [vmem:[#allocation7 + $0x130] sm:$0xff] }
  0x6a   :  { %1308 = vmatprep.subr.bf16.mxu1 %v1736_v38  ;;  %v207_v38 = vld [vmem:[#allocation7 + $0x530] sm:$0xff]  ;;  %v1674_v41 = vcombine.high %v75_v35, %v79_v36  ;;  %v1673_v47 = vcombine.low %v75_v35, %v79_v36 }
  0x6b   :  { %1334 = vmatpush1.bf16.msra.mxu0 %v1799_v43  ;;  %v1802_v42 = vcombine.high %v203_v37, %v207_v38  ;;  %v67_v43 = vld [vmem:[#allocation7 + $0xd0] sm:$0xff]  ;;  %v1801_v48 = vcombine.low %v203_v37, %v207_v38 }
  0x6c   :  { %1335 = vmatprep.subr.bf16.mxu0 %v1792_v45  ;;  %v195_v45 = vld [vmem:[#allocation7 + $0x4d0] sm:$0xff] }
  0x6d   :  { %1309 = vmatpush2.bf16.msra.mxu1 %v1735_v44  ;;  %v71_v44 = vld [vmem:[#allocation7 + $0xf0] sm:$0xff] }
  0x6e   :  { %1310 = vmatprep.subr.bf16.mxu1 %v1728_v46  ;;  %v199_v46 = vld [vmem:[#allocation7 + $0x4f0] sm:$0xff]  ;;  %v1666_v49 = vcombine.high %v67_v43, %v71_v44  ;;  %v1665_v55 = vcombine.low %v67_v43, %v71_v44 }
  0x6f   :  { %1336 = vmatpush1.bf16.msra.mxu0 %v1791_v51  ;;  %v1794_v50 = vcombine.high %v195_v45, %v199_v46  ;;  %v59_v51 = vld [vmem:[#allocation7 + $0x90] sm:$0xff]  ;;  %v1793_v56 = vcombine.low %v195_v45, %v199_v46 }
  0x70   :  { %1337 = vmatprep.subr.bf16.mxu0 %v1784_v53  ;;  %v187_v53 = vld [vmem:[#allocation7 + $0x490] sm:$0xff] }
  0x71   :  { %1311 = vmatpush2.bf16.msra.mxu1 %v1727_v52  ;;  %v63_v52 = vld [vmem:[#allocation7 + $0xb0] sm:$0xff] }
  0x72   :  { %1312 = vmatprep.subr.bf16.mxu1 %v1720_v54  ;;  %v191_v54 = vld [vmem:[#allocation7 + $0x4b0] sm:$0xff]  ;;  %v1658_v58 = vcombine.high %v59_v51, %v63_v52  ;;  %v1657_v2 = vcombine.low %v59_v51, %v63_v52 }
  0x73   :  { %1338 = vmatpush1.bf16.msra.mxu0 %v1783_v61  ;;  %v1786_v59 = vcombine.high %v187_v53, %v191_v54  ;;  %v51_v61 = vld [vmem:[#allocation7 + $0x50] sm:$0xff]  ;;  %v1785_v3 = vcombine.low %v187_v53, %v191_v54 }
  0x74   :  { %1339 = vmatprep.subr.bf16.mxu0 %v1776_v63  ;;  %v179_v63 = vld [vmem:[#allocation7 + $0x450] sm:$0xff] }
  0x75   :  { %1313 = vmatpush2.bf16.msra.mxu1 %v1719_v62  ;;  %v55_v62 = vld [vmem:[#allocation7 + $0x70] sm:$0xff] }
  0x76   :  { %1314 = vmatprep.subr.bf16.mxu1 %v1712_v1  ;;  %v183_v1 = vld [vmem:[#allocation7 + $0x470] sm:$0xff]  ;;  %v1650_v4 = vcombine.high %v51_v61, %v55_v62  ;;  %v1649_v10 = vcombine.low %v51_v61, %v55_v62 }
  0x77   :  { %1340 = vmatpush1.bf16.msra.mxu0 %v1775_v6  ;;  %v1778_v5 = vcombine.high %v179_v63, %v183_v1  ;;  %v43_v6 = vld [vmem:[#allocation7 + $0x10] sm:$0xff]  ;;  %v1777_v11 = vcombine.low %v179_v63, %v183_v1 }
  0x78   :  { %1341 = vmatprep.subr.bf16.mxu0 %v1768_v8  ;;  %v171_v8 = vld [vmem:[#allocation7 + $0x410] sm:$0xff] }
  0x79   :  { %1315 = vmatpush2.bf16.msra.mxu1 %v1711_v7  ;;  %v47_v7 = vld [vmem:[#allocation7 + $0x30] sm:$0xff] }
  0x7a   :  { %1316 = vmatprep.subr.bf16.mxu1 %v1704_v9  ;;  %v175_v9 = vld [vmem:[#allocation7 + $0x430] sm:$0xff]  ;;  %v1642_v12 = vcombine.high %v43_v6, %v47_v7  ;;  %v1641_v20 = vcombine.low %v43_v6, %v47_v7 }
  0x7b   :  { %1342 = vmatpush1.bf16.msra.mxu0 %v1767_v15  ;;  %v1770_v13 = vcombine.high %v171_v8, %v175_v9  ;;  %v163_v15 = vld [vmem:[#allocation7 + $0x3d0] sm:$0xff]  ;;  %v1769_v21 = vcombine.low %v171_v8, %v175_v9 }
  0x7c   :  { %1368 = vmatprep.subr.bf16.mxu0 %v1698_v18  ;;  %v100_v18 = vld [vmem:[#allocation7 + $0x1d8] sm:$0xff]  ;;  %v123_v54 = vld [vmem:[#allocation7 + $0x290] sm:$0xff] }
  0x7d   :  { %1317 = vmatpush2.bf16.msra.mxu1 %v1703_v16  ;;  %v167_v16 = vld [vmem:[#allocation7 + $0x3f0] sm:$0xff] }
  0x7e   :  { %1409 = vmatprep.subr.bf16.mxu1 %v1826_v19  ;;  %1360 = vmatmul.mubr.bf16.vlgmr.msra.gmra.mxu0 %v1957_v14  ;;  %v104_v19 = vld [vmem:[#allocation7 + $0x1f8] sm:$0xff]  ;;  %v1762_v22 = vcombine.high %v163_v15, %v167_v16  ;;  %v1761_v28 = vcombine.low %v163_v15, %v167_v16  ;;  %v115_v1 = vld [vmem:[#allocation7 + $0x250] sm:$0xff] }
  0x7f   :  { %1369 = vmatpush1.bf16.msra.mxu0 %v1697_v24  ;;  %1400 = vmatprep.mubr.bf16.mxu0 %v1954_v60  ;;  %v1700_v23 = vcombine.high %v100_v18, %v104_v19  ;;  %v155_v24 = vld [vmem:[#allocation7 + $0x390] sm:$0xff]  ;;  %v1699_v57 = vcombine.low %v100_v18, %v104_v19  ;;  %v228_v19 = vld [vmem:[#allocation7 + $0x5d8] sm:$0xff] }
  0x80   :  { %1319 = vmatmul.mubr.bf16.vlgmr.msra.gmra.mxu1 %v1963_v17  ;;  %1370 = vmatprep.subr.bf16.mxu0 %v1690_v26  ;;  %v92_v26 = vld [vmem:[#allocation7 + $0x198] sm:$0xff]  ;;  %v107_v9 = vld [vmem:[#allocation7 + $0x210] sm:$0xff] }
  0x81   :  { %1410 = vmatpush1.bf16.msra.mxu1 %v1825_v25  ;;  %1441 = vmatprep.mubr.bf16.mxu1 %v1926_v0  ;;  %v159_v25 = vld [vmem:[#allocation7 + $0x3b0] sm:$0xff] }
  0x82   :  { %1411 = vmatprep.subr.bf16.mxu1 %v1818_v27  ;;  %v96_v27 = vld [vmem:[#allocation7 + $0x1b8] sm:$0xff]  ;;  %v1754_v29 = vcombine.high %v155_v24, %v159_v25  ;;  %v1753_v35 = vcombine.low %v155_v24, %v159_v25 }
  0x83   :  { %1371 = vmatpush1.bf16.msra.mxu0 %v1689_v31  ;;  %v1692_v30 = vcombine.high %v92_v26, %v96_v27  ;;  %v147_v31 = vld [vmem:[#allocation7 + $0x350] sm:$0xff]  ;;  %v1691_v36 = vcombine.low %v92_v26, %v96_v27  ;;  %v220_v27 = vld [vmem:[#allocation7 + $0x598] sm:$0xff] }
  0x84   :  { %1372 = vmatprep.subr.bf16.mxu0 %v1682_v33  ;;  %v84_v33 = vld [vmem:[#allocation7 + $0x158] sm:$0xff] }
  0x85   :  { %1412 = vmatpush1.bf16.msra.mxu1 %v1817_v32  ;;  %v151_v32 = vld [vmem:[#allocation7 + $0x370] sm:$0xff] }
  0x86   :  { %1413 = vmatprep.subr.bf16.mxu1 %v1810_v34  ;;  %v88_v34 = vld [vmem:[#allocation7 + $0x178] sm:$0xff]  ;;  %v1746_v37 = vcombine.high %v147_v31, %v151_v32  ;;  %v1745_v43 = vcombine.low %v147_v31, %v151_v32 }
  0x87   :  { %1373 = vmatpush1.bf16.msra.mxu0 %v1681_v39  ;;  %v1684_v38 = vcombine.high %v84_v33, %v88_v34  ;;  %v139_v39 = vld [vmem:[#allocation7 + $0x310] sm:$0xff]  ;;  %v1683_v44 = vcombine.low %v84_v33, %v88_v34  ;;  %v212_v34 = vld [vmem:[#allocation7 + $0x558] sm:$0xff] }
  0x88   :  { %1374 = vmatprep.subr.bf16.mxu0 %v1674_v41  ;;  %v76_v41 = vld [vmem:[#allocation7 + $0x118] sm:$0xff] }
  0x89   :  { %1414 = vmatpush1.bf16.msra.mxu1 %v1809_v40  ;;  %v143_v40 = vld [vmem:[#allocation7 + $0x330] sm:$0xff] }
  0x8a   :  { %1415 = vmatprep.subr.bf16.mxu1 %v1802_v42  ;;  %v80_v42 = vld [vmem:[#allocation7 + $0x138] sm:$0xff]  ;;  %v1738_v45 = vcombine.high %v139_v39, %v143_v40  ;;  %v1737_v51 = vcombine.low %v139_v39, %v143_v40 }
  0x8b   :  { %1375 = vmatpush1.bf16.msra.mxu0 %v1673_v47  ;;  %v1676_v46 = vcombine.high %v76_v41, %v80_v42  ;;  %v131_v47 = vld [vmem:[#allocation7 + $0x2d0] sm:$0xff]  ;;  %v1675_v52 = vcombine.low %v76_v41, %v80_v42  ;;  %v204_v42 = vld [vmem:[#allocation7 + $0x518] sm:$0xff] }
  0x8c   :  { %1376 = vmatprep.subr.bf16.mxu0 %v1666_v49  ;;  %v68_v49 = vld [vmem:[#allocation7 + $0xd8] sm:$0xff] }
  0x8d   :  { %1416 = vmatpush1.bf16.msra.mxu1 %v1801_v48  ;;  %v135_v48 = vld [vmem:[#allocation7 + $0x2f0] sm:$0xff] }
  0x8e   :  { %1417 = vmatprep.subr.bf16.mxu1 %v1794_v50  ;;  %v72_v50 = vld [vmem:[#allocation7 + $0xf8] sm:$0xff] }
  0x8f   :  { %1377 = vmatpush1.bf16.msra.mxu0 %v1665_v55  ;;  %v1668_v53 = vcombine.high %v68_v49, %v72_v50  ;;  %v127_v55 = vld [vmem:[#allocation7 + $0x2b0] sm:$0xff]  ;;  %v1667_v61 = vcombine.low %v68_v49, %v72_v50  ;;  %v196_v50 = vld [vmem:[#allocation7 + $0x4d8] sm:$0xff] }
  0x90   :  { %1378 = vmatprep.subr.bf16.mxu0 %v1658_v58  ;;  %v64_v58 = vld [vmem:[#allocation7 + $0xb8] sm:$0xff]  ;;  %v1722_v62 = vcombine.high %v123_v54, %v127_v55 }
  0x91   :  { %1418 = vmatpush1.bf16.msra.mxu1 %v1793_v56  ;;  %v60_v56 = vld [vmem:[#allocation7 + $0x98] sm:$0xff] }
  0x92   :  { %1419 = vmatprep.subr.bf16.mxu1 %v1786_v59  ;;  %v1729_v59 = vcombine.low %v131_v47, %v135_v48  ;;  %v1660_v63 = vcombine.high %v60_v56, %v64_v58  ;;  %v1659_v6 = vcombine.low %v60_v56, %v64_v58  ;;  %v188_v56 = vld [vmem:[#allocation7 + $0x498] sm:$0xff] }
  0x93   :  { %1379 = vmatpush1.bf16.msra.mxu0 %v1657_v2  ;;  %v119_v2 = vld [vmem:[#allocation7 + $0x270] sm:$0xff]  ;;  %v192_v58 = vld [vmem:[#allocation7 + $0x4b8] sm:$0xff] }
  0x94   :  { %1380 = vmatprep.subr.bf16.mxu0 %v1650_v4  ;;  %v56_v4 = vld [vmem:[#allocation7 + $0x78] sm:$0xff]  ;;  %v1714_v7 = vcombine.high %v115_v1, %v119_v2 }
  0x95   :  { %1420 = vmatpush1.bf16.msra.mxu1 %v1785_v3  ;;  %v52_v3 = vld [vmem:[#allocation7 + $0x58] sm:$0xff] }
  0x96   :  { %1421 = vmatprep.subr.bf16.mxu1 %v1778_v5  ;;  %v1721_v5 = vcombine.low %v123_v54, %v127_v55  ;;  %v1652_v8 = vcombine.high %v52_v3, %v56_v4  ;;  %v1651_v15 = vcombine.low %v52_v3, %v56_v4  ;;  %v180_v3 = vld [vmem:[#allocation7 + $0x458] sm:$0xff] }
  0x97   :  { %1381 = vmatpush1.bf16.msra.mxu0 %v1649_v10  ;;  %v111_v10 = vld [vmem:[#allocation7 + $0x230] sm:$0xff]  ;;  %v184_v4 = vld [vmem:[#allocation7 + $0x478] sm:$0xff] }
  0x98   :  { %1382 = vmatprep.subr.bf16.mxu0 %v1642_v12  ;;  %v48_v12 = vld [vmem:[#allocation7 + $0x38] sm:$0xff]  ;;  %v1706_v16 = vcombine.high %v107_v9, %v111_v10 }
  0x99   :  { %1422 = vmatpush1.bf16.msra.mxu1 %v1777_v11  ;;  %v44_v11 = vld [vmem:[#allocation7 + $0x18] sm:$0xff] }
  0x9a   :  { %1423 = vmatprep.subr.bf16.mxu1 %v1770_v13  ;;  %v1713_v13 = vcombine.low %v115_v1, %v119_v2  ;;  %v1644_v18 = vcombine.high %v44_v11, %v48_v12  ;;  %v1643_v24 = vcombine.low %v44_v11, %v48_v12  ;;  %v1788_v1 = vcombine.high %v188_v56, %v192_v58  ;;  %v172_v11 = vld [vmem:[#allocation7 + $0x418] sm:$0xff] }
  0x9b   :  { %1383 = vmatpush1.bf16.msra.mxu0 %v1641_v20  ;;  %v232_v20 = vld [vmem:[#allocation7 + $0x5f8] sm:$0xff] }
  0x9c   :  { %1384 = vmatprep.subr.bf16.mxu0 %v1762_v22  ;;  %v168_v22 = vld [vmem:[#allocation7 + $0x3f8] sm:$0xff]  ;;  %v1828_v25 = vcombine.high %v228_v19, %v232_v20 }
  0x9d   :  { %1424 = vmatpush1.bf16.msra.mxu1 %v1769_v21  ;;  %v164_v21 = vld [vmem:[#allocation7 + $0x3d8] sm:$0xff] }
  0x9e   :  { %1450 = vmatprep.subr.bf16.mxu1 %v1700_v23  ;;  %v1705_v23 = vcombine.low %v107_v9, %v111_v10  ;;  %v1764_v26 = vcombine.high %v164_v21, %v168_v22  ;;  %v1763_v31 = vcombine.low %v164_v21, %v168_v22  ;;  %v1780_v9 = vcombine.high %v180_v3, %v184_v4  ;;  %v176_v12 = vld [vmem:[#allocation7 + $0x438] sm:$0xff] }
  0x9f   :  { %1385 = vmatpush2.bf16.msra.mxu0 %v1761_v28  ;;  %v224_v28 = vld [vmem:[#allocation7 + $0x5b8] sm:$0xff]  ;;  %v1771_v21 = vcombine.low %v172_v11, %v176_v12 }
  0xa0   :  { %1442 = vmatmul.mubr.bf16.vlgmr.msra.gmra.mxu1 %v1957_v14  ;;  %1386 = vmatprep.subr.bf16.mxu0 %v1754_v29  ;;  %v160_v29 = vld [vmem:[#allocation7 + $0x3b8] sm:$0xff]  ;;  %v1820_v32 = vcombine.high %v220_v27, %v224_v28 }
  0xa1   :  { %1451 = vmatpush1.bf16.msra.mxu1 %v1699_v57  ;;  %1482 = vmatprep.mubr.bf16.mxu1 %v1954_v60  ;;  %v1730_v60 = vcombine.high %v131_v47, %v135_v48  ;;  %v156_v57 = vld [vmem:[#allocation7 + $0x398] sm:$0xff] }
  0xa2   :  { %1452 = vmatprep.subr.bf16.mxu1 %v1692_v30  ;;  %v1827_v30 = vcombine.low %v228_v19, %v232_v20  ;;  %v1756_v33 = vcombine.high %v156_v57, %v160_v29  ;;  %v1755_v39 = vcombine.low %v156_v57, %v160_v29  ;;  %v1772_v19 = vcombine.high %v172_v11, %v176_v12 }
  0xa3   :  { %1387 = vmatpush2.bf16.msra.mxu0 %v1753_v35  ;;  %v216_v35 = vld [vmem:[#allocation7 + $0x578] sm:$0xff] }
  0xa4   :  { %1388 = vmatprep.subr.bf16.mxu0 %v1746_v37  ;;  %v152_v37 = vld [vmem:[#allocation7 + $0x378] sm:$0xff]  ;;  %v1812_v40 = vcombine.high %v212_v34, %v216_v35 }
  0xa5   :  { %1453 = vmatpush1.bf16.msra.mxu1 %v1691_v36  ;;  %v148_v36 = vld [vmem:[#allocation7 + $0x358] sm:$0xff] }
  0xa6   :  { %1454 = vmatprep.subr.bf16.mxu1 %v1684_v38  ;;  %v1819_v38 = vcombine.low %v220_v27, %v224_v28  ;;  %v1748_v41 = vcombine.high %v148_v36, %v152_v37  ;;  %v1747_v47 = vcombine.low %v148_v36, %v152_v37 }
  0xa7   :  { %1389 = vmatpush2.bf16.msra.mxu0 %v1745_v43  ;;  %v208_v43 = vld [vmem:[#allocation7 + $0x538] sm:$0xff] }
  0xa8   :  { %1390 = vmatprep.subr.bf16.mxu0 %v1738_v45  ;;  %v144_v45 = vld [vmem:[#allocation7 + $0x338] sm:$0xff]  ;;  %v1804_v48 = vcombine.high %v204_v42, %v208_v43 }
  0xa9   :  { %1455 = vmatpush1.bf16.msra.mxu1 %v1683_v44  ;;  %v140_v44 = vld [vmem:[#allocation7 + $0x318] sm:$0xff] }
  0xaa   :  { %1456 = vmatprep.subr.bf16.mxu1 %v1676_v46  ;;  %v1811_v46 = vcombine.low %v212_v34, %v216_v35  ;;  %v1740_v49 = vcombine.high %v140_v44, %v144_v45 }
  0xab   :  { %1391 = vmatpush2.bf16.msra.mxu0 %v1737_v51  ;;  %v132_v51 = vld [vmem:[#allocation7 + $0x2d8] sm:$0xff] }
  0xac   :  { %1392 = vmatprep.subr.bf16.mxu0 %v1730_v60  ;;  %v1803_v60 = vcombine.low %v204_v42, %v208_v43 }
  0xad   :  { %1457 = vmatpush1.bf16.msra.mxu1 %v1675_v52  ;;  %v136_v52 = vld [vmem:[#allocation7 + $0x2f8] sm:$0xff] }
  0xae   :  { %1458 = vmatprep.subr.bf16.mxu1 %v1668_v53  ;;  %v1739_v53 = vcombine.low %v140_v44, %v144_v45  ;;  %v1732_v55 = vcombine.high %v132_v51, %v136_v52 }
  0xaf   :  { %1393 = vmatpush2.bf16.msra.mxu0 %v1729_v59  ;;  %v124_v59 = vld [vmem:[#allocation7 + $0x298] sm:$0xff] }
  0xb0   :  { %1394 = vmatprep.subr.bf16.mxu0 %v1722_v62 }
  0xb1   :  { %1459 = vmatpush1.bf16.msra.mxu1 %v1667_v61  ;;  %v128_v61 = vld [vmem:[#allocation7 + $0x2b8] sm:$0xff] }
  0xb2   :  { %1460 = vmatprep.subr.bf16.mxu1 %v1660_v63  ;;  %v1731_v63 = vcombine.low %v132_v51, %v136_v52  ;;  %v1724_v2 = vcombine.high %v124_v59, %v128_v61 }
  0xb3   :  { %1395 = vmatpush2.bf16.msra.mxu0 %v1721_v5  ;;  %v116_v5 = vld [vmem:[#allocation7 + $0x258] sm:$0xff] }
  0xb4   :  { %1396 = vmatprep.subr.bf16.mxu0 %v1714_v7  ;;  %v1787_v7 = vcombine.low %v188_v56, %v192_v58 }
  0xb5   :  { %1461 = vmatpush1.bf16.msra.mxu1 %v1659_v6  ;;  %v120_v6 = vld [vmem:[#allocation7 + $0x278] sm:$0xff] }
  0xb6   :  { %1462 = vmatprep.subr.bf16.mxu1 %v1652_v8  ;;  %v1723_v8 = vcombine.low %v124_v59, %v128_v61  ;;  %v1716_v10 = vcombine.high %v116_v5, %v120_v6 }
  0xb7   :  { %1397 = vmatpush2.bf16.msra.mxu0 %v1713_v13  ;;  %v108_v13 = vld [vmem:[#allocation7 + $0x218] sm:$0xff] }
  0xb8   :  { %1398 = vmatprep.subr.bf16.mxu0 %v1706_v16  ;;  %v1779_v16 = vcombine.low %v180_v3, %v184_v4 }
  0xb9   :  { %1463 = vmatpush1.bf16.msra.mxu1 %v1651_v15  ;;  %v112_v15 = vld [vmem:[#allocation7 + $0x238] sm:$0xff] }
  0xba   :  { %1464 = vmatprep.subr.bf16.mxu1 %v1644_v18  ;;  %v1715_v18 = vcombine.low %v116_v5, %v120_v6  ;;  %v1708_v20 = vcombine.high %v108_v13, %v112_v15  ;;  %v1707_v22 = vcombine.low %v108_v13, %v112_v15 }
  0xbb   :  { %1399 = vmatpush2.bf16.msra.mxu0 %v1705_v23 }
  0xbc   :  { %1491 = vmatprep.subr.bf16.mxu0 %v1828_v25 }
  0xbd   :  { %1465 = vmatpush1.bf16.msra.mxu1 %v1643_v24 }
  0xbe   :  { %1466 = vmatprep.subr.bf16.mxu1 %v1764_v26  ;;  %1401 = vmatmul.mubr.bf16.vlgmr.msra.gmra.mxu0 %v1963_v17 }
  0xbf   :  { %1492 = vmatpush1.bf16.msra.mxu0 %v1827_v30  ;;  %1523 = vmatprep.mubr.bf16.mxu0 %v1926_v0  ;;  %v200_v0 = vld [vmem:[#allocation7 + $0x4f8] sm:$0xff] }
  0xc0   :  { %1493 = vmatprep.subr.bf16.mxu0 %v1820_v32  ;;  %v1796_v54 = vcombine.high %v196_v50, %v200_v0  ;;  %v1795_v62 = vcombine.low %v196_v50, %v200_v0 }
  0xc1   :  { %1467 = vmatpush2.bf16.msra.mxu1 %v1763_v31 }
  0xc2   :  { %1468 = vmatprep.subr.bf16.mxu1 %v1756_v33 }
  0xc3   :  { %1494 = vmatpush1.bf16.msra.mxu0 %v1819_v38 }
  0xc4   :  { %1495 = vmatprep.subr.bf16.mxu0 %v1812_v40 }
  0xc5   :  { %1469 = vmatpush2.bf16.msra.mxu1 %v1755_v39 }
  0xc6   :  { %1470 = vmatprep.subr.bf16.mxu1 %v1748_v41 }
  0xc7   :  { %1496 = vmatpush1.bf16.msra.mxu0 %v1811_v46 }
  0xc8   :  { %1497 = vmatprep.subr.bf16.mxu0 %v1804_v48  ;;  %v1532_v48 = vlaneseq }
  0xc9   :  { %1471 = vmatpush2.bf16.msra.mxu1 %v1747_v47 }
  0xca   :  { %1472 = vmatprep.subr.bf16.mxu1 %v1740_v49  ;;  %v1533_v49 = vand.u32 127, %v1532_v48 }
  0xcb   :  { %1498 = vmatpush1.bf16.msra.mxu0 %v1803_v60 }
  0xcc   :  { %1499 = vmatprep.subr.bf16.mxu0 %v1796_v54  ;;  %v1540_v50 = vadd.s32 896, %v1533_v49 }
  0xcd   :  { %1473 = vmatpush2.bf16.msra.mxu1 %v1739_v53 }
  0xce   :  { %1474 = vmatprep.subr.bf16.mxu1 %v1732_v55  ;;  %vm1548_vm0 = vcmp.lt.s32.totalorder %v1540_v50, 1000 }
  0xcf   :  { %1500 = vmatpush1.bf16.msra.mxu0 %v1795_v62 }
  0xd0   :  { %1501 = vmatprep.subr.bf16.mxu0 %v1788_v1 }
  0xd1   :  { %1475 = vmatpush2.bf16.msra.mxu1 %v1731_v63 }
  0xd2   :  { %1476 = vmatprep.subr.bf16.mxu1 %v1724_v2 }
  0xd3   :  { %1502 = vmatpush1.bf16.msra.mxu0 %v1787_v7 }
  0xd4   :  { %1503 = vmatprep.subr.bf16.mxu0 %v1780_v9 }
  0xd5   :  { %1477 = vmatpush2.bf16.msra.mxu1 %v1723_v8 }
  0xd6   :  { %1478 = vmatprep.subr.bf16.mxu1 %v1716_v10 }
  0xd7   :  { %1504 = vmatpush1.bf16.msra.mxu0 %v1779_v16 }
  0xd8   :  { %1505 = vmatprep.subr.bf16.mxu0 %v1772_v19 }
  0xd9   :  { %1479 = vmatpush2.bf16.msra.mxu1 %v1715_v18 }
  0xda   :  { %1480 = vmatprep.subr.bf16.mxu1 %v1708_v20 }
  0xdb   :  { %1506 = vmatpush1.bf16.msra.mxu0 %v1771_v21 }
  0xdd   :  { %1481 = vmatpush2.bf16.msra.mxu1 %v1707_v22 }
  0xde   :  { %1524 = vmatmul.mubr.bf16.vlgmr.msra.gmra.mxu0 %v1957_v14 }
  0xe0   :  { %1483 = vmatmul.mubr.bf16.vlgmr.msra.gmra.mxu1 %v1963_v17 }
 0x100   :  { %v1279_v23 = vpop.f32.mrf.mxu1 }
 0x102   :  { %v1281_v24 = vpop.f32.mrf.mxu1 }
 0x104   :  { %v1283_v25 = vpop.f32.mrf.mxu1 }
 0x106   :  { %v1284_v26 = vpop.f32.mrf.mxu1 }
 0x11e   :  { %v1238_v27 = vpop.f32.mrf.mxu0 }
 0x11f   :  { %v1977_v28 = vadd.f32 %v1279_v23, %v1238_v27 }
 0x120   :  { %v1240_v57 = vpop.f32.mrf.mxu0 }
 0x121   :  { %v1979_v29 = vadd.f32 %v1281_v24, %v1240_v57 }
 0x122   :  { %v1242_v30 = vpop.f32.mrf.mxu0 }
 0x124   :  { %v1243_v31 = vpop.f32.mrf.mxu0 }
 0x13e   :  { %v1361_v32 = vpop.f32.mrf.mxu0 }
 0x140   :  { %v1320_v33 = vpop.f32.mrf.mxu1  ;;  %v1363_v35 = vpop.f32.mrf.mxu0 }
 0x141   :  { %v1981_v34 = vadd.f32 %v1361_v32, %v1320_v33 }
 0x142   :  { %v1322_v14 = vpop.f32.mrf.mxu1  ;;  %v1365_v17 = vpop.f32.mrf.mxu0 }
 0x143   :  { %v1983_v36 = vadd.f32 %v1363_v35, %v1322_v14 }
 0x144   :  { %v1324_v37 = vpop.f32.mrf.mxu1  ;;  %v1366_v38 = vpop.f32.mrf.mxu0 }
 0x146   :  { %v1325_v39 = vpop.f32.mrf.mxu1 }
 0x160   :  { %v1443_v40 = vpop.f32.mrf.mxu1 }
 0x162   :  { %v1445_v41 = vpop.f32.mrf.mxu1 }
 0x164   :  { %v1447_v42 = vpop.f32.mrf.mxu1 }
 0x166   :  { %v1448_v43 = vpop.f32.mrf.mxu1 }
 0x17e   :  { %v1402_v44 = vpop.f32.mrf.mxu0 }
 0x17f   :  { %v1987_v53 = vadd.f32 %v1443_v40, %v1402_v44 }
 0x180   :  { %v1404_v45 = vpop.f32.mrf.mxu0 }
 0x181   :  { %v1985_v51 = vadd.f32 %v1445_v41, %v1404_v45  ;;  %v1557_v2 = vmax.f32 %v1977_v28, %v1987_v53 }
 0x182   :  { %v1406_v46 = vpop.f32.mrf.mxu0 }
 0x183   :  { %v1558_v61 = vmax.f32 %v1979_v29, %v1985_v51 }
 0x184   :  { %v1407_v47 = vpop.f32.mrf.mxu0 }
 0x185   :  { %v1561_v5 = vmax.f32 %v1557_v2, %v1558_v61 }
 0x19e   :  { %v1525_v0 = vpop.f32.mrf.mxu0 }
 0x1a0   :  { %v1484_v52 = vpop.f32.mrf.mxu1  ;;  %v1527_v60 = vpop.f32.mrf.mxu0 }
 0x1a1   :  { %v1989_v54 = vadd.f32 %v1525_v0, %v1484_v52 }
 0x1a2   :  { %v1486_v55 = vpop.f32.mrf.mxu1  ;;  %v1529_v58 = vpop.f32.mrf.mxu0 }
 0x1a3   :  { %v1528_v56 = vadd.f32 %v1527_v60, %v1486_v55  ;;  %v1559_v3 = vmax.f32 %v1981_v34, %v1989_v54 }
 0x1a4   :  { %v1488_v59 = vpop.f32.mrf.mxu1  ;;  %v1530_v63 = vpop.f32.mrf.mxu0 }
 0x1a5   :  { %v1993_v62 = vsel %vm1548_vm0, %v1528_v56, -inf }
 0x1a6   :  { %v1489_v1 = vpop.f32.mrf.mxu1  ;;  %v1560_v4 = vmax.f32 %v1983_v36, %v1993_v62 }
 0x1a8   :  { %v1562_v6 = vmax.f32 %v1559_v3, %v1560_v4 }
 0x1aa   :  { %v1563_v7 = vmax.f32 %v1561_v5, %v1562_v6 }
 0x1ac   :  { %1564 = vmax.xlane.f32.xlu0 %v1563_v7 }
 0x235   :  { %v1565_v8 = vpop.xlane.xlu0 %1564 }
 0x236   :  { %v1566_v9 = vsub.f32 %v1977_v28, %v1565_v8  ;;  %v1567_v10 = vsub.f32 %v1979_v29, %v1565_v8  ;;  %v1568_v11 = vsub.f32 %v1981_v34, %v1565_v8  ;;  %v1569_v12 = vsub.f32 %v1983_v36, %v1565_v8 }
 0x237   :  { %v1570_v18 = vsub.f32 %v1987_v53, %v1565_v8  ;;  %v1571_v19 = vsub.f32 %v1985_v51, %v1565_v8  ;;  %v1572_v21 = vsub.f32 %v1989_v54, %v1565_v8  ;;  %v1573_v23 = vsub.f32 %v1993_v62, %v1565_v8 }
 0x238   :  { %v1574_v13 = vmul.f32 1.442695, %v1566_v9  ;;  %v1576_v15 = vmul.f32 1.442695, %v1567_v10  ;;  %v1578_v16 = vmul.f32 1.442695, %v1568_v11 }
 0x239   :  { %v1580_v20 = vmul.f32 1.442695, %v1569_v12  ;;  %v1582_v22 = vmul.f32 1.442695, %v1570_v18  ;;  %v1584_v24 = vmul.f32 1.442695, %v1571_v19 }
 0x23a   :  { %1838 = vpow2.f32 %v1574_v13  ;;  %v1586_v25 = vmul.f32 1.442695, %v1572_v21  ;;  %v1588_v26 = vmul.f32 1.442695, %v1573_v23 }
 0x23b   :  { %1840 = vpow2.f32 %v1576_v15 }
 0x23c   :  { %1842 = vpow2.f32 %v1578_v16 }
 0x23d   :  { %1844 = vpow2.f32 %v1580_v20 }
 0x23e   :  { %1846 = vpow2.f32 %v1582_v22 }
 0x23f   :  { %1848 = vpow2.f32 %v1584_v24 }
 0x240   :  { %1850 = vpow2.f32 %v1586_v25 }
 0x241   :  { %1852 = vpow2.f32 %v1588_v26 }
 0x247   :  { %v1839_v27 = vpop.eup %1838 }
 0x248   :  { %v1841_v57 = vpop.eup %1840 }
 0x249   :  { %v1590_v30 = vadd.f32 %v1841_v57, %v1839_v27  ;;  %v1843_v31 = vpop.eup %1842 }
 0x24a   :  { %v1845_v33 = vpop.eup %1844 }
 0x24b   :  { %v1591_v32 = vadd.f32 %v1843_v31, %v1590_v30  ;;  %v1847_v14 = vpop.eup %1846 }
 0x24c   :  { %v1849_v37 = vpop.eup %1848 }
 0x24d   :  { %v1592_v35 = vadd.f32 %v1845_v33, %v1591_v32  ;;  %v1851_v39 = vpop.eup %1850 }
 0x24e   :  { %v1853_v41 = vpop.eup %1852 }
 0x24f   :  { %v1593_v17 = vadd.f32 %v1847_v14, %v1592_v35 }
 0x251   :  { %v1594_v38 = vadd.f32 %v1849_v37, %v1593_v17 }
 0x253   :  { %v1595_v40 = vadd.f32 %v1851_v39, %v1594_v38 }
 0x255   :  { %v1596_v42 = vadd.f32 %v1853_v41, %v1595_v40 }
 0x257   :  { %1597 = vadd.xlane.f32.xlu0 %v1596_v42 }
 0x2e0   :  { %v1598_v43 = vpop.xlane.xlu0 %1597 }
 0x2e1   :  { %1854 = vlog2.f32 %v1598_v43 }
 0x2ee   :  { %v1855_v44 = vpop.eup %1854 }
 0x2ef   :  { %v1600_v45 = vmul.f32 0.6931472, %v1855_v44 }
 0x2f1   :  { %v1601_v46 = vadd.f32 %v1600_v45, %v1565_v8 }
 0x2f3   :  { %v1602_v47 = vsub.f32 %v1977_v28, %v1601_v46  ;;  %v1603_v48 = vsub.f32 %v1979_v29, %v1601_v46  ;;  %v1604_v49 = vsub.f32 %v1981_v34, %v1601_v46  ;;  %v1605_v50 = vsub.f32 %v1983_v36, %v1601_v46 }
 0x2f4   :  { %v1606_v0 = vsub.f32 %v1987_v53, %v1601_v46  ;;  %v1607_v52 = vsub.f32 %v1985_v51, %v1601_v46  ;;  %v1608_v60 = vsub.f32 %v1989_v54, %v1601_v46  ;;  %v1609_v55 = vsub.f32 %v1993_v62, %v1601_v46 }
 0x2f5   :  { %1610 = vst [vmem:[#allocation9] sm:$0xff] %v1602_v47  ;;  %1611 = vst [vmem:[#allocation9 + $0x8] sm:$0xff] %v1603_v48 }
 0x2f6   :  { %1612 = vst [vmem:[#allocation9 + $0x10] sm:$0xff] %v1604_v49  ;;  %1613 = vst [vmem:[#allocation9 + $0x18] sm:$0xff] %v1605_v50 }
 0x2f7   :  { %1614 = vst [vmem:[#allocation9 + $0x20] sm:$0xff] %v1606_v0  ;;  %1615 = vst [vmem:[#allocation9 + $0x28] sm:$0xff] %v1607_v52 }
 0x2f8   :  { %1616 = vst [vmem:[#allocation9 + $0x30] sm:$0xff] %v1608_v60  ;;  %1617 = vst [vmem:[#allocation9 + $0x38] sm:$0xff] %v1609_v55 }
 0x2f9   :  { %1907 = shalt.err (!%p1904_p0)
}
 0x2fa   :  { %1627 = dma.vmem_to_hbm [thread:$0]  %s1625_s1, 1024, %s2022_s2, [#allocation6]  }
 0x2fb   :  { %1920 = dma.done.wait [#allocation6], 1024  }
 0x2fc   :  { %1921 = vsyncadd [#allocation6], 4294966272 }
 0x2fd   :  { %1631 = vsyncpa [#allocation5], 1 }
 0x2fe   :  { %1632 = vsyncpa [#allocation8], 1 }
 0x2ff   :  { %1633 = vsyncpa [#allocation6], 1 }

</bundles_post_ra>
